<compile_context>
chip_gen: v7x
topology: tpu7x:2x2x1
jax: 0.10.0
libtpu: 0.0.40
codegen_flags: <defaults>
</compile_context>

<pallas_src>
import math

import jax
import jax.numpy as jnp
from jax import lax
from jax.experimental import pallas as pl
from jax.experimental.pallas import tpu as pltpu

BN_EPS = 1e-5        # PyTorch nn.BatchNorm1d default eps
LANES = 128
SUBLANES = 8


def _round_up(n, m):
    return (n + m - 1) // m * m


def pack_params(params):
    """Pack every parameter into one lane-padded f32 slab (done once).

    lin4/lin5 are folded host-side (W45 = w4 @ w5, b45 = b4 @ w5 + b5): in the
    reference forward, lin5 is applied to lin4's *raw* output (the tanh'd copy
    is stored in a dead variable), so the two affine maps compose exactly.

    Multi-row weights (all multiples of 8 rows) are placed first so they stay
    sublane-aligned; the small weights and all 1-row vectors are packed densely
    after them.  Returns (slab[f32, R x 128], layout: name -> (row, rows, cols)).
    """
    w45 = params["w4"] @ params["w5"]                   # (nchan2, num_sym)
    b45 = params["b4"] @ params["w5"] + params["b5"]    # (1, num_sym)

    entries = [
        # 8-row-aligned weights first
        ("w1", params["w1"]), ("w2", params["w2"]),
        ("w3", params["w3"]), ("w6", params["w6"]),
        # small weights + 1-row vectors packed densely afterwards
        ("wc", params["wc"]), ("w45", w45),
        ("b1", params["b1"]), ("b2", params["b2"]), ("b3", params["b3"]),
        ("bc", params["bc"]), ("gamma", params["gamma"]),
        ("beta", params["beta"]), ("b45", b45), ("b6", params["b6"]),
    ]
    layout = {}
    blocks = []
    row = 0
    for name, arr in entries:
        arr = jnp.asarray(arr, jnp.float32)
        r, c = arr.shape
        layout[name] = (row, r, c)
        blocks.append(jnp.pad(arr, ((0, 0), (0, LANES - c))))
        row += r
    slab = jnp.concatenate(blocks, axis=0)
    pad_rows = _round_up(row, SUBLANES) - row
    if pad_rows:
        slab = jnp.pad(slab, ((0, pad_rows), (0, 0)))
    return slab, layout


def make_kernel(layout, batch):
    inv_n = 1.0 / float(batch)

    def get(p_ref, name):
        r0, rows, cols = layout[name]
        return p_ref[r0:r0 + rows, 0:cols]

    def kernel(std_ref, x_ref, p_ref, noise_ref, out_ref):
        x = x_ref[...]

        # ---- encoder: three MXU matmuls with fused bias + tanh ----
        h = jnp.tanh(jnp.dot(x, get(p_ref, "w1"),
                             preferred_element_type=jnp.float32)
                     + get(p_ref, "b1"))
        h = jnp.tanh(jnp.dot(h, get(p_ref, "w2"),
                             preferred_element_type=jnp.float32)
                     + get(p_ref, "b2"))
        h = jnp.tanh(jnp.dot(h, get(p_ref, "w3"),
                             preferred_element_type=jnp.float32)
                     + get(p_ref, "b3"))                       # (B, 2)

        # ---- lin_c: tiny K=2 matmul on the (otherwise idle) MXU ----
        hc = jnp.dot(h, get(p_ref, "wc"),
                     preferred_element_type=jnp.float32) \
            + get(p_ref, "bc")                                 # (B, nchan2)

        # ---- BatchNorm1d (training-mode batch stats), single pass ----
        s1 = jnp.sum(hc, axis=0, keepdims=True)
        s2 = jnp.sum(hc * hc, axis=0, keepdims=True)
        mean = s1 * inv_n
        var = s2 * inv_n - mean * mean                         # biased var
        hn = (hc - mean) * lax.rsqrt(var + BN_EPS) * get(p_ref, "gamma") \
            + get(p_ref, "beta")
        hn = jnp.tanh(hn)

        # ---- AWGN channel: host-supplied N(0,1) noise, runtime std scalar ---
        # TODO(synk): Noise_2's (flag % 5) gating semantics are unknown;
        # implemented as plain AWGN with the module's std_dev.
        chan = hn + std_ref[0] * noise_ref[...]

        # ---- decoder: folded lin4+lin5 (tanh(lin4) is dead in the ref) ----
        rec = jnp.tanh(jnp.dot(chan, get(p_ref, "w45"),
                               preferred_element_type=jnp.float32)
                       + get(p_ref, "b45"))                    # (B, num_sym)

        # ---- lin6: exact-width output, stored directly (no wrapper slice) ---
        out = jnp.dot(rec, get(p_ref, "w6"),
                      preferred_element_type=jnp.float32) \
            + get(p_ref, "b6")
        out_ref[...] = out.astype(out_ref.dtype)

    return kernel


def build_forward(layout, batch, num_sym):
    """Build the pallas_call + jitted wrapper ONCE (cache-friendly)."""
    kernel = make_kernel(layout, batch)
    vmem = pl.BlockSpec(memory_space=pltpu.MemorySpace.VMEM)
    smem = pl.BlockSpec(memory_space=pltpu.MemorySpace.SMEM)
    call = pl.pallas_call(
        kernel,
        out_shape=jax.ShapeDtypeStruct((batch, num_sym), jnp.float32),
        in_specs=[smem, vmem, vmem, vmem],
        out_specs=vmem,
    )

    @jax.jit
    def forward(x, slab, noise, std_dev):
        return call(std_dev, x, slab, noise)

    return forward


def init_linear(key, fan_in, fan_out):
    # Deterministic PyTorch-style init: U(-1/sqrt(fan_in), 1/sqrt(fan_in)).
    # Weights stored pre-transposed as [in_features, out_features].
    kw, kb = jax.random.split(key)
    bound = 1.0 / math.sqrt(fan_in)
    w = jax.random.uniform(kw, (fan_in, fan_out), jnp.float32, -bound, bound)
    b = jax.random.uniform(kb, (1, fan_out), jnp.float32, -bound, bound)
    return w, b


if __name__ == "__main__":
    # Small sizes implied by the module name comm_16_2:
    num_sym = 16          # 16 messages -> one-hot input of width 16
    num_chan = 2          # 2 complex channel uses -> num_chan*2 = 4 reals
    hidden = 32           # hidden_neurons (small for the example)
    batch = 8             # for production throughput, scale batch up and add a
                          # "parallel" batch grid (v7x dual-TC); kernel body is
                          # batch-agnostic.
    nchan2 = num_chan * 2

    train_snr = 7
    rate = math.log2(num_sym) / (2.0 * num_chan)
    ebno = 10.0 ** (train_snr / 10.0)
    std_dev = math.sqrt(1.0 / (2.0 * ebno * rate))

    key = jax.random.PRNGKey(0)
    keys = jax.random.split(key, 10)

    params = {}
    params["w1"], params["b1"] = init_linear(keys[0], num_sym, num_sym)
    params["w2"], params["b2"] = init_linear(keys[1], num_sym, hidden)
    params["w3"], params["b3"] = init_linear(keys[2], hidden, 2)
    params["wc"], params["bc"] = init_linear(keys[3], 2, nchan2)
    params["w4"], params["b4"] = init_linear(keys[4], nchan2, hidden)
    params["w5"], params["b5"] = init_linear(keys[5], hidden, num_sym)
    params["w6"], params["b6"] = init_linear(keys[6], num_sym, num_sym)
    params["gamma"] = jnp.ones((1, nchan2), jnp.float32)
    params["beta"] = jnp.zeros((1, nchan2), jnp.float32)

    # Setup-time (once): pack the parameter slab and build/jit the forward.
    slab, layout = pack_params(params)
    forward = build_forward(layout, batch, num_sym)

    # One-hot message inputs (standard for this autoencoder-style comm model).
    msgs = jax.random.randint(keys[7], (batch,), 0, num_sym)
    x = jax.nn.one_hot(msgs, num_sym, dtype=jnp.float32)

    # Host-side standard-normal noise (statistically equivalent to torch.randn,
    # not bit-matching) and the runtime std_dev scalar (SMEM).
    noise = jax.random.normal(keys[8], (batch, nchan2), jnp.float32)
    std = jnp.array([std_dev], dtype=jnp.float32)

    out = forward(x, slab, noise, std)
    jax.block_until_ready(out)
    assert out.shape == (batch, num_sym)
    print("KERNEL_OK")
</pallas_src>

<mosaic_0001>
module attributes {stable_mosaic.version = 11 : i64} {
  func.func @kernel(%arg0: memref<1xf32, #tpu.memory_space<smem>>, %arg1: memref<8x16xf32, #tpu.memory_space<vmem>>, %arg2: memref<96x128xf32, #tpu.memory_space<vmem>>, %arg3: memref<8x4xf32, #tpu.memory_space<vmem>>, %arg4: memref<8x16xf32, #tpu.memory_space<vmem>>) attributes {dimension_semantics = [], scalar_prefetch = 0 : i64, scratch_operands = 0 : i64, tpu.core_type = #tpu.core_type<tc>} {
    %c0 = arith.constant 0 : index
    %c0_0 = arith.constant 0 : index
    %0 = vector.load %arg1[%c0, %c0_0] : memref<8x16xf32, #tpu.memory_space<vmem>>, vector<8x16xf32>
    %c0_1 = arith.constant 0 : index
    %c0_2 = arith.constant 0 : index
    %1 = vector.load %arg2[%c0_1, %c0_2] : memref<96x128xf32, #tpu.memory_space<vmem>>, vector<16x16xf32>
    %cst = arith.constant dense<0.000000e+00> : vector<8x16xf32>
    %2 = tpu.matmul %0, %1, %cst {dimension_numbers = #tpu.dot_dimension_numbers<[1], [0], [0], [1], [0, 0, 1, 1], [], []>} : vector<8x16xf32>, vector<16x16xf32>, vector<8x16xf32> -> vector<8x16xf32>
    %c86 = arith.constant 86 : index
    %c0_3 = arith.constant 0 : index
    %3 = vector.load %arg2[%c86, %c0_3] : memref<96x128xf32, #tpu.memory_space<vmem>>, vector<1x16xf32>
    %4 = vector.broadcast %3 : vector<1x16xf32> to vector<8x16xf32>
    %5 = arith.addf %2, %4 : vector<8x16xf32>
    %6 = math.tanh %5 : vector<8x16xf32>
    %c16 = arith.constant 16 : index
    %c0_4 = arith.constant 0 : index
    %7 = vector.load %arg2[%c16, %c0_4] : memref<96x128xf32, #tpu.memory_space<vmem>>, vector<16x32xf32>
    %cst_5 = arith.constant dense<0.000000e+00> : vector<8x32xf32>
    %8 = tpu.matmul %6, %7, %cst_5 {dimension_numbers = #tpu.dot_dimension_numbers<[1], [0], [0], [1], [0, 0, 1, 1], [], []>} : vector<8x16xf32>, vector<16x32xf32>, vector<8x32xf32> -> vector<8x32xf32>
    %c87 = arith.constant 87 : index
    %c0_6 = arith.constant 0 : index
    %9 = vector.load %arg2[%c87, %c0_6] : memref<96x128xf32, #tpu.memory_space<vmem>>, vector<1x32xf32>
    %10 = vector.broadcast %9 : vector<1x32xf32> to vector<8x32xf32>
    %11 = arith.addf %8, %10 : vector<8x32xf32>
    %12 = math.tanh %11 : vector<8x32xf32>
    %c32 = arith.constant 32 : index
    %c0_7 = arith.constant 0 : index
    %13 = vector.load %arg2[%c32, %c0_7] : memref<96x128xf32, #tpu.memory_space<vmem>>, vector<32x2xf32>
    %cst_8 = arith.constant dense<0.000000e+00> : vector<8x2xf32>
    %14 = tpu.matmul %12, %13, %cst_8 {dimension_numbers = #tpu.dot_dimension_numbers<[1], [0], [0], [1], [0, 0, 1, 1], [], []>} : vector<8x32xf32>, vector<32x2xf32>, vector<8x2xf32> -> vector<8x2xf32>
    %c88 = arith.constant 88 : index
    %c0_9 = arith.constant 0 : index
    %15 = vector.load %arg2[%c88, %c0_9] : memref<96x128xf32, #tpu.memory_space<vmem>>, vector<1x2xf32>
    %16 = vector.broadcast %15 : vector<1x2xf32> to vector<8x2xf32>
    %17 = arith.addf %14, %16 : vector<8x2xf32>
    %18 = math.tanh %17 : vector<8x2xf32>
    %c80 = arith.constant 80 : index
    %c0_10 = arith.constant 0 : index
    %19 = vector.load %arg2[%c80, %c0_10] : memref<96x128xf32, #tpu.memory_space<vmem>>, vector<2x4xf32>
    %cst_11 = arith.constant dense<0.000000e+00> : vector<8x4xf32>
    %20 = tpu.matmul %18, %19, %cst_11 {dimension_numbers = #tpu.dot_dimension_numbers<[1], [0], [0], [1], [0, 0, 1, 1], [], []>} : vector<8x2xf32>, vector<2x4xf32>, vector<8x4xf32> -> vector<8x4xf32>
    %c89 = arith.constant 89 : index
    %c0_12 = arith.constant 0 : index
    %21 = vector.load %arg2[%c89, %c0_12] : memref<96x128xf32, #tpu.memory_space<vmem>>, vector<1x4xf32>
    %22 = vector.broadcast %21 : vector<1x4xf32> to vector<8x4xf32>
    %23 = arith.addf %20, %22 : vector<8x4xf32>
    %cst_13 = arith.constant dense<0.000000e+00> : vector<4xf32>
    %24 = vector.multi_reduction <add>, %23, %cst_13 [0] : vector<8x4xf32> to vector<4xf32>
    %25 = vector.shape_cast %24 : vector<4xf32> to vector<1x4xf32>
    %26 = arith.mulf %23, %23 : vector<8x4xf32>
    %cst_14 = arith.constant dense<0.000000e+00> : vector<4xf32>
    %27 = vector.multi_reduction <add>, %26, %cst_14 [0] : vector<8x4xf32> to vector<4xf32>
    %28 = vector.shape_cast %27 : vector<4xf32> to vector<1x4xf32>
    %cst_15 = arith.constant 1.250000e-01 : f32
    %29 = vector.broadcast %cst_15 : f32 to vector<1x4xf32>
    %30 = arith.mulf %25, %29 : vector<1x4xf32>
    %cst_16 = arith.constant 1.250000e-01 : f32
    %31 = vector.broadcast %cst_16 : f32 to vector<1x4xf32>
    %32 = arith.mulf %28, %31 : vector<1x4xf32>
    %33 = arith.mulf %30, %30 : vector<1x4xf32>
    %34 = arith.subf %32, %33 : vector<1x4xf32>
    %35 = vector.broadcast %30 : vector<1x4xf32> to vector<8x4xf32>
    %36 = arith.subf %23, %35 : vector<8x4xf32>
    %cst_17 = arith.constant 9.99999974E-6 : f32
    %37 = vector.broadcast %cst_17 : f32 to vector<1x4xf32>
    %38 = arith.addf %34, %37 : vector<1x4xf32>
    %39 = math.rsqrt %38 : vector<1x4xf32>
    %40 = vector.broadcast %39 : vector<1x4xf32> to vector<8x4xf32>
    %41 = arith.mulf %36, %40 : vector<8x4xf32>
    %c90 = arith.constant 90 : index
    %c0_18 = arith.constant 0 : index
    %42 = vector.load %arg2[%c90, %c0_18] : memref<96x128xf32, #tpu.memory_space<vmem>>, vector<1x4xf32>
    %43 = vector.broadcast %42 : vector<1x4xf32> to vector<8x4xf32>
    %44 = arith.mulf %41, %43 : vector<8x4xf32>
    %c91 = arith.constant 91 : index
    %c0_19 = arith.constant 0 : index
    %45 = vector.load %arg2[%c91, %c0_19] : memref<96x128xf32, #tpu.memory_space<vmem>>, vector<1x4xf32>
    %46 = vector.broadcast %45 : vector<1x4xf32> to vector<8x4xf32>
    %47 = arith.addf %44, %46 : vector<8x4xf32>
    %48 = math.tanh %47 : vector<8x4xf32>
    %c0_20 = arith.constant 0 : index
    %49 = memref.load %arg0[%c0_20] : memref<1xf32, #tpu.memory_space<smem>>
    %c0_21 = arith.constant 0 : index
    %c0_22 = arith.constant 0 : index
    %50 = vector.load %arg3[%c0_21, %c0_22] : memref<8x4xf32, #tpu.memory_space<vmem>>, vector<8x4xf32>
    %51 = vector.broadcast %49 : f32 to vector<8x4xf32>
    %52 = arith.mulf %51, %50 : vector<8x4xf32>
    %53 = arith.addf %48, %52 : vector<8x4xf32>
    %c82 = arith.constant 82 : index
    %c0_23 = arith.constant 0 : index
    %54 = vector.load %arg2[%c82, %c0_23] : memref<96x128xf32, #tpu.memory_space<vmem>>, vector<4x16xf32>
    %cst_24 = arith.constant dense<0.000000e+00> : vector<8x16xf32>
    %55 = tpu.matmul %53, %54, %cst_24 {dimension_numbers = #tpu.dot_dimension_numbers<[1], [0], [0], [1], [0, 0, 1, 1], [], []>} : vector<8x4xf32>, vector<4x16xf32>, vector<8x16xf32> -> vector<8x16xf32>
    %c92 = arith.constant 92 : index
    %c0_25 = arith.constant 0 : index
    %56 = vector.load %arg2[%c92, %c0_25] : memref<96x128xf32, #tpu.memory_space<vmem>>, vector<1x16xf32>
    %57 = vector.broadcast %56 : vector<1x16xf32> to vector<8x16xf32>
    %58 = arith.addf %55, %57 : vector<8x16xf32>
    %59 = math.tanh %58 : vector<8x16xf32>
    %c64 = arith.constant 64 : index
    %c0_26 = arith.constant 0 : index
    %60 = vector.load %arg2[%c64, %c0_26] : memref<96x128xf32, #tpu.memory_space<vmem>>, vector<16x16xf32>
    %cst_27 = arith.constant dense<0.000000e+00> : vector<8x16xf32>
    %61 = tpu.matmul %59, %60, %cst_27 {dimension_numbers = #tpu.dot_dimension_numbers<[1], [0], [0], [1], [0, 0, 1, 1], [], []>} : vector<8x16xf32>, vector<16x16xf32>, vector<8x16xf32> -> vector<8x16xf32>
    %c93 = arith.constant 93 : index
    %c0_28 = arith.constant 0 : index
    %62 = vector.load %arg2[%c93, %c0_28] : memref<96x128xf32, #tpu.memory_space<vmem>>, vector<1x16xf32>
    %63 = vector.broadcast %62 : vector<1x16xf32> to vector<8x16xf32>
    %64 = arith.addf %61, %63 : vector<8x16xf32>
    %c0_29 = arith.constant 0 : index
    %c0_30 = arith.constant 0 : index
    %65 = vector.load %arg4[%c0_29, %c0_30] : memref<8x16xf32, #tpu.memory_space<vmem>>, vector<8x16xf32>
    tpu.vector_store %arg4[%c0_29, %c0_30], %64 {strides = array<i32>} : memref<8x16xf32, #tpu.memory_space<vmem>>, vector<8x16xf32>,
    return
  }
}

</mosaic_0001>

<bundles_post_ra>
// kernel: forward.1
= control target key start
LH: loop header
LB: loop body
LE: loop exit
PB: predicated region body
PF: predicated region fallthrough
CT: control target
= control target key end

     0   :  { %10 = vsyncpa [#allocation4], 0  ;;  %s823_s0 = inlined_call_operand.<no memory space> [shape: f32[1], index: 0, kind: input, shape index: {}]   ;;  %s824_s1 = inlined_call_operand.vmem [shape: f32[8,16], index: 1, kind: input, shape index: {}]   ;;  %s825_s2 = inlined_call_operand.hbm [shape: f32[96,128], index: 2, kind: input, shape index: {}]   ;;  %s826_s3 = inlined_call_operand.vmem [shape: f32[8,4], index: 3, kind: input, shape index: {}]   ;;  %s827_s4 = inlined_call_operand.hbm [shape: f32[8,16], index: 4, kind: output, shape index: {}]  }
   0x1   :  { %11 = vsyncpa [#allocation5], 0  ;;  %s745_s15 = smov [#allocation3]   ;;  %s697_s19 = scalar_lea.hbm %s825_s2, 1536 }
   0x2   :  { %s21_s16 = sshll.u32 %s745_s15, 4  ;;  %p698_p0 = scmp.ne.s32.totalorder %s825_s2, %s697_s19  ;;  %s22_s16 = int_to_ptr.vmem [resolvable:$true] %s21_s16 }
   0x3   :  { %p701_p1 = scmp.lt.u32.totalorder %s697_s19, %s825_s2 }
   0x5   :  { %p703_p2 = pnand %p701_p1, %p698_p0 }
   0x7   :  { %706 = shalt.err (!%p703_p2)
}
   0x8   :  { %s707_s24 = scalar_lea.vmem %s22_s16, 1536  ;;  %p712_p4 = scmp.lt.s32.totalorder %s22_s16, %s22_s16 }
   0x9   :  { %p708_p3 = scmp.ne.s32.totalorder %s22_s16, %s707_s24  ;;  %p713_p5 = scmp.lt.s32.totalorder %s707_s24, %s707_s24 }
   0xb   :  { %p714_p6 = por %p713_p5, %p712_p4 }
   0xd   :  { %p715_p7 = pnand %p714_p6, %p708_p3 }
   0xf   :  { %718 = shalt.err (!%p715_p7)
}
  0x10   :  { %s746_s25 = smov 128   ;;  %s747_s26 = smov 8  }
  0x11   :  { %27 = dma.hbm_to_vmem [thread:$0]  %s825_s2, 1536, %s22_s16, [#allocation4], %s746_s25, %s746_s25, %s747_s26  }
  0x12   :  { %741 = dma.done.wait [#allocation4], 1536  }
  0x13   :  { %742 = vsyncadd [#allocation4], 4294965760  ;;  %v748_v0 = vmov 0.0|0.0   ;;  %vm749_vm0 = vmmov 0   ;;  %v750_v1 = vmov 0.0   ;;  %v34_v2 = vld [vmem:[#allocation3] sm:$0xff] }
  0x14   :  { %663 = vmatprep.subr.bf16.mxu0 %v748_v0  ;;  %625 = vmatprep.mubr.msk.f32.mxu0 %vm749_vm0, %v750_v1  ;;  %v35_v3 = vld [vmem:[#allocation3 + $0x8] sm:$0xff]  ;;  %v33_v5 = vld [vmem:[%s824_s1] sm:$0xff]  ;;  %vm41_vm1 = vcmask 130048   ;;  %v116_v6 = vld [vmem:[#allocation3 + $0x10] sm:$0xff]  ;;  %vm206_vm2 = vcmask 261120   ;;  %vm291_vm3 = vcmask 1041408  }
  0x15   :  { %666 = vmatprep.subr.bf16.mxu1 %v748_v0  ;;  %632 = vmatprep.mubr.msk.f32.mxu1 %vm749_vm0, %v750_v1  ;;  %v664_v4 = vpack.c.bf16 %v35_v3, %v34_v2  ;;  %v117_v7 = vld [vmem:[#allocation3 + $0x18] sm:$0xff]  ;;  %v587_v9 = vld [vmem:[#allocation3 + $0x56] ss:$0 sm:$0xff]  ;;  %v197_v14 = vld [vmem:[#allocation3 + $0x20] sm:$0xff]  ;;  %vm287_vm4 = vcmask 15360   ;;  %vm416_vm5 = vcmask 1043456  }
  0x16   :  { %v667_v8 = vpack.c.bf16 %v117_v7, %v116_v6  ;;  %v198_v15 = vld [vmem:[#allocation3 + $0x28] sm:$0xff]  ;;  %v199_v16 = vld [vmem:[#allocation3 + $0x30] sm:$0xff]  ;;  %v200_v18 = vld [vmem:[#allocation3 + $0x38] sm:$0xff]  ;;  %vm365_vm6 = vcmask 31744  }
  0x17   :  { %665 = vmatpush3.bf16.msra.mxu0 %v664_v4  ;;  %v670_v17 = vpack.c.bf16 %v198_v15, %v197_v14  ;;  %v673_v19 = vpack.c.bf16 %v200_v18, %v199_v16  ;;  %v589_v20 = vld [vmem:[#allocation3 + $0x57] ss:$0 sm:$0xff]  ;;  %v281_v25 = vld [vmem:[#allocation3 + $0x50] sm:$0x3]  ;;  %v591_v26 = vld [vmem:[#allocation3 + $0x58] ss:$0 sm:$0xff] }
  0x18   :  { %669 = vmatprep.subr.bf16.mxu0 %v748_v0  ;;  %668 = vmatpush3.bf16.msra.mxu1 %v667_v8  ;;  %v407_v31 = vld [vmem:[#allocation3 + $0x52] sm:$0xf]  ;;  %v593_v32 = vld [vmem:[#allocation3 + $0x59] ss:$0 sm:$0xff]  ;;  %v596_v58 = vld [vmem:[#allocation3 + $0x5a] ss:$0 sm:$0xff] }
  0x19   :  { %646 = vmatprep.subr.mxu1 %v750_v1  ;;  %v597_v60 = vld [vmem:[#allocation3 + $0x5b] ss:$0 sm:$0xff]  ;;  %v403_v63 = vld [vmem:[%s826_s3] sm:$0xff]  ;;  %v598_v7 = vld [vmem:[#allocation3 + $0x5c] ss:$0 sm:$0xff]  ;;  %s751_s3 = smov [#allocation6]  }
  0x1a   :  { %626 = vmatmul.mubr.msk.f32.vlgmr.msra.gmra.mrb[0].mxu0 %vm41_vm1, %v33_v5  ;;  %v491_v4 = vld [vmem:[#allocation3 + $0x40] sm:$0xff]  ;;  %v492_v5 = vld [vmem:[#allocation3 + $0x48] sm:$0xff] }
  0x1b   :  { %643 = vmatprep.mubr.msk.f32.mxu0 %vm749_vm0, %v750_v1  ;;  %671 = vmatpush3.bf16.msra.mxu0 %v670_v17  ;;  %v676_v6 = vpack.c.bf16 %v492_v5, %v491_v4 }
  0x1c   :  { %672 = vmatprep.subr.bf16.mxu0 %v748_v0 }
  0x1f   :  { %674 = vmatpush3.bf16.msra.mxu0 %v673_v19 }
  0x20   :  { %675 = vmatprep.subr.bf16.mxu0 %v748_v0  ;;  %v404_v0 = vstv %s823_s0  ;;  %s578_s0 = sshll.u32 %s751_s3, 4  ;;  %s579_s0 = int_to_ptr.vmem [resolvable:$true] %s578_s0 }
  0x21   :  { %s719_s7 = scalar_lea.vmem %s579_s0, 128  ;;  %p724_p9 = scmp.lt.s32.totalorder %s579_s0, %s579_s0 }
  0x22   :  { %p720_p8 = scmp.ne.s32.totalorder %s579_s0, %s719_s7  ;;  %p725_p10 = scmp.lt.s32.totalorder %s719_s7, %s719_s7 }
  0x24   :  { %p726_p11 = por %p725_p10, %p724_p9 }
  0x26   :  { %p727_p12 = pnand %p726_p11, %p720_p8 }
  0xed   :  { %v111_v10 = vpop.f32.mrb[0].mxu0 }
  0xee   :  { %v112_v11 = vadd.f32 %v587_v9, %v111_v10  ;;  %v627_v12 = vpop.f32.mrb[1].mxu0 }
  0xef   :  { %v601_v12 = vld [vmem:[#allocation3 + $0x5d] ss:$0 sm:$0xff] }
  0xf0   :  { %685 = vtanh.f32 %v112_v11 }
  0xfa   :  { %v686_v13 = vpop.eup %685 }
  0xfb   :  { %633 = vmatmul.mubr.msk.f32.vlgmr.msra.gmra.mrb[0].mxu1 %vm41_vm1, %v686_v13 }
  0xfc   :  { %648 = vmatprep.mubr.msk.f32.mxu1 %vm749_vm0, %v750_v1  ;;  %647 = vmatpush3.msk.msra.mxu1 %vm291_vm3, %v281_v25 }
  0xfd   :  { %651 = vmatprep.subr.mxu1 %v750_v1 }
 0x1ce   :  { %v192_v21 = vpop.f32.mrb[0].mxu1 }
 0x1cf   :  { %v193_v22 = vadd.f32 %v589_v20, %v192_v21  ;;  %v634_v23 = vpop.f32.mrb[1].mxu1 }
 0x1d1   :  { %687 = vtanh.f32 %v193_v22 }
 0x1db   :  { %v688_v24 = vpop.eup %687 }
 0x1dc   :  { %644 = vmatmul.mubr.msk.f32.vlgmr.msra.gmra.mrb[2].mxu0 %vm206_vm2, %v688_v24 }
 0x1dd   :  { %660 = vmatprep.mubr.msk.f32.mxu0 %vm749_vm0, %v750_v1  ;;  %677 = vmatpush3.bf16.msra.mxu0 %v676_v6 }
 0x2af   :  { %v276_v27 = vpop.f32.mrb[2].mxu0 }
 0x2b0   :  { %v277_v28 = vadd.f32 %v591_v26, %v276_v27  ;;  %v645_v29 = vpop.f32.mrb[3].mxu0 }
 0x2b2   :  { %689 = vtanh.f32 %v277_v28 }
 0x2bc   :  { %v690_v30 = vpop.eup %689 }
 0x2bd   :  { %649 = vmatmul.mubr.msk.f32.vlgmr.msra.gmra.mrb[2].mxu1 %vm287_vm4, %v690_v30 }
 0x2be   :  { %653 = vmatprep.mubr.msk.f32.mxu1 %vm749_vm0, %v750_v1  ;;  %652 = vmatpush3.msk.msra.mxu1 %vm416_vm5, %v407_v31  ;;  %v405_v1 = vmul.f32 %v404_v0, %v403_v63 }
 0x390   :  { %v361_v33 = vpop.f32.mrb[2].mxu1 }
 0x391   :  { %v362_v34 = vadd.f32 %v593_v32, %v361_v33  ;;  %v650_v35 = vpop.f32.mrb[3].mxu1 }
 0x393   :  { %v366_v36 = vsel %vm365_vm6, %v362_v34, 0.0  ;;  %v373_v37 = vmul.f32 %v362_v34, %v362_v34 }
 0x394   :  { %v367_v38 = vrot.slane %v366_v36, 4 }
 0x395   :  { %v374_v39 = vsel %vm365_vm6, %v373_v37, 0.0 }
 0x396   :  { %v368_v40 = vadd.f32 %v367_v38, %v366_v36  ;;  %v375_v41 = vrot.slane %v374_v39, 4 }
 0x398   :  { %v369_v42 = vrot.slane %v368_v40, 2  ;;  %v376_v43 = vadd.f32 %v375_v41, %v374_v39 }
 0x39a   :  { %v370_v44 = vadd.f32 %v369_v42, %v368_v40  ;;  %v377_v45 = vrot.slane %v376_v43, 2 }
 0x39c   :  { %v371_v46 = vrot.slane %v370_v44, 1  ;;  %v378_v47 = vadd.f32 %v377_v45, %v376_v43 }
 0x39e   :  { %v372_v48 = vadd.f32 %v371_v46, %v370_v44  ;;  %v379_v49 = vrot.slane %v378_v47, 1 }
 0x3a0   :  { %v380_v50 = vadd.f32 %v379_v49, %v378_v47  ;;  %v381_v51 = vmul.f32 0.125, %v372_v48 }
 0x3a2   :  { %v382_v52 = vmul.f32 0.125, %v380_v50  ;;  %v383_v53 = vmul.f32 %v381_v51, %v381_v51  ;;  %v385_v56 = vsub.f32 %v362_v34, %v381_v51 }
 0x3a4   :  { %v384_v54 = vsub.f32 %v382_v52, %v383_v53 }
 0x3a6   :  { %v386_v55 = vadd.f32 1e-05, %v384_v54 }
 0x3a8   :  { %691 = vrsqrt.f32 %v386_v55 }
 0x3b2   :  { %v692_v57 = vpop.eup %691 }
 0x3b3   :  { %v388_v59 = vmul.f32 %v692_v57, %v385_v56 }
 0x3b5   :  { %v394_v61 = vmul.f32 %v596_v58, %v388_v59 }
 0x3b7   :  { %v400_v62 = vadd.f32 %v597_v60, %v394_v61 }
 0x3b9   :  { %693 = vtanh.f32 %v400_v62 }
 0x3c3   :  { %v694_v2 = vpop.eup %693 }
 0x3c4   :  { %v406_v3 = vadd.f32 %v694_v2, %v405_v1 }
 0x3c6   :  { %654 = vmatmul.mubr.msk.f32.vlgmr.msra.gmra.mrb[4].mxu1 %vm365_vm6, %v406_v3 }
 0x499   :  { %v486_v8 = vpop.f32.mrb[4].mxu1 }
 0x49a   :  { %v487_v9 = vadd.f32 %v598_v7, %v486_v8  ;;  %v655_v10 = vpop.f32.mrb[5].mxu1 }
 0x49c   :  { %695 = vtanh.f32 %v487_v9 }
 0x4a6   :  { %v696_v11 = vpop.eup %695 }
 0x4a7   :  { %661 = vmatmul.mubr.msk.f32.vlgmr.msra.gmra.mrb[4].mxu0 %vm41_vm1, %v696_v11 }
 0x57a   :  { %v567_v13 = vpop.f32.mrb[4].mxu0 }
 0x57b   :  { %v568_v14 = vadd.f32 %v601_v12, %v567_v13  ;;  %v662_v15 = vpop.f32.mrb[5].mxu0 }
 0x57d   :  { %571 = vst.msk [vmem:[#allocation6] sm:$0xff] %vm41_vm1, %v568_v14 }
 0x57e   :  { %730 = shalt.err (!%p727_p12)
}
 0x57f   :  { %s731_s10 = scalar_lea.hbm %s827_s4, 128 }
 0x580   :  { %p732_p13 = scmp.ne.s32.totalorder %s827_s4, %s731_s10  ;;  %p735_p0 = scmp.lt.u32.totalorder %s731_s10, %s827_s4 }
 0x582   :  { %p737_p1 = pnand %p735_p0, %p732_p13 }
 0x584   :  { %740 = shalt.err (!%p737_p1)
}
 0x585   :  { %581 = dma.vmem_to_hbm [thread:$0]  %s579_s0, 128, %s827_s4, [#allocation5]  }
 0x586   :  { %743 = dma.done.wait [#allocation5], 128  }
 0x587   :  { %744 = vsyncadd [#allocation5], 4294967168 }
 0x588   :  { %585 = vsyncpa [#allocation4], 1 }
 0x589   :  { %586 = vsyncpa [#allocation5], 1 }

</bundles_post_ra>
